<compile_context>
chip_gen: v7x
topology: tpu7x:2x2x1
jax: 0.10.0
libtpu: 0.0.40
codegen_flags: <defaults>
</compile_context>

<pallas_src>
import functools
import math

import jax
import jax.numpy as jnp
from jax.experimental import pallas as pl
from jax.experimental.pallas import tpu as pltpu

# ----------------------------- model hyper-params (small, runnable example) -----
SEQ = 8          # sequence length
BATCH = 2        # batch size
D_MODEL = 32     # n_embd (downscaled from 1024 for the small runnable example)
N_HEAD = 2       # matches module
D_FF = 64        # dim_feedforward (downscaled from the default 2048)
LN_EPS = 1e-5


def _layernorm(x, gamma, beta):
    mu = jnp.mean(x, axis=-1, keepdims=True)
    var = jnp.mean((x - mu) * (x - mu), axis=-1, keepdims=True)
    inv = jax.lax.rsqrt(var + LN_EPS)
    return (x - mu) * inv * gamma + beta


def encoder_kernel(
    x_ref, pe_ref,
    wqkv_ref, bqkv_ref,
    wo_ref, bo_ref,
    ln1_g_ref, ln1_b_ref, ln2_g_ref, ln2_b_ref,
    w1_ref, b1_ref, w2_ref, b2_ref,
    w_dec_ref, b_dec_ref,
    out_ref,
    *, num_heads,
):
    S, D = x_ref.shape                       # per-batch block: (S, D)
    hd = D // num_heads

    # --- positional encoding (dropout = identity in eval mode) -------------------
    x = x_ref[...] + pe_ref[...]                                         # (S, D)

    # --- causal mask: single r >= c compare, no mod/div --------------------------
    r = jax.lax.broadcasted_iota(jnp.int32, (S, S), 0)
    c = jax.lax.broadcasted_iota(jnp.int32, (S, S), 1)
    mask = jnp.where(r >= c, 0.0, -1e30).astype(jnp.float32)             # (S, S)

    # --- fused, lane-dense QKV projection (1/sqrt(hd) pre-folded into Q cols) ----
    qkv = jnp.dot(x, wqkv_ref[...],
                  preferred_element_type=jnp.float32) + bqkv_ref[...]    # (S, 3D)

    # --- multi-head self-attention; head-merge folded into output projection -----
    attn = None
    for h in range(num_heads):                                           # static loop
        q_h = qkv[:, h * hd:(h + 1) * hd]                                # (S, hd)
        k_h = qkv[:, D + h * hd:D + (h + 1) * hd]                        # (S, hd)
        v_h = qkv[:, 2 * D + h * hd:2 * D + (h + 1) * hd]                # (S, hd)
        # Q @ K^T without an explicit transpose op: contract last dims of both.
        s = jax.lax.dot_general(
            q_h, k_h, dimension_numbers=(((1,), (1,)), ((), ())),
            preferred_element_type=jnp.float32) + mask                   # (S, S)
        m = jnp.max(s, axis=-1, keepdims=True)
        p = jnp.exp(s - m)
        p = p * pl.reciprocal(jnp.sum(p, axis=-1, keepdims=True), approx=True)
        ctx = jnp.dot(p, v_h, preferred_element_type=jnp.float32)        # (S, hd)
        contrib = jnp.dot(ctx, wo_ref[h],
                          preferred_element_type=jnp.float32)            # (S, D)
        attn = contrib if attn is None else attn + contrib
    attn = attn + bo_ref[...]

    # residual + LayerNorm 1 (post-norm encoder layer)
    x = _layernorm(x + attn, ln1_g_ref[...], ln1_b_ref[...])

    # --- feed-forward (ReLU); weights pre-transposed in the wrapper --------------
    h1 = jnp.dot(x, w1_ref[...], preferred_element_type=jnp.float32) + b1_ref[...]
    h1 = jnp.maximum(h1, 0.0)
    h2 = jnp.dot(h1, w2_ref[...], preferred_element_type=jnp.float32) + b2_ref[...]

    # residual + LayerNorm 2
    x = _layernorm(x + h2, ln2_g_ref[...], ln2_b_ref[...])

    # --- decoder Linear(D, 1), emitted lane-dense as a (1, S) row -----------------
    y = jax.lax.dot_general(
        w_dec_ref[...], x, dimension_numbers=(((1,), (1,)), ((), ())),
        preferred_element_type=jnp.float32) + b_dec_ref[...]             # (1, S)
    out_ref[...] = y


def positional_encoding(seq_len, d_model):
    position = jnp.arange(seq_len, dtype=jnp.float32)[:, None]
    div_term = jnp.exp(jnp.arange(0, d_model, 2, dtype=jnp.float32)
                       * (-math.log(10000.0) / d_model))
    pe = jnp.zeros((seq_len, d_model), jnp.float32)
    pe = pe.at[:, 0::2].set(jnp.sin(position * div_term))
    pe = pe.at[:, 1::2].set(jnp.cos(position * div_term))
    return pe


def init_params(key, d_model, n_head, d_ff):
    ks = jax.random.split(key, 6)
    u = lambda k, shape, s: jax.random.uniform(k, shape, jnp.float32, -s, s)
    xav_in = math.sqrt(6.0 / (3 * d_model + d_model))
    params = dict(
        w_in=u(ks[0], (3 * d_model, d_model), xav_in),          # xavier_uniform
        b_in=jnp.zeros((1, 3 * d_model), jnp.float32),
        w_out=u(ks[1], (d_model, d_model), 1.0 / math.sqrt(d_model)),
        b_out=jnp.zeros((1, d_model), jnp.float32),
        ln1_g=jnp.ones((1, d_model), jnp.float32),
        ln1_b=jnp.zeros((1, d_model), jnp.float32),
        ln2_g=jnp.ones((1, d_model), jnp.float32),
        ln2_b=jnp.zeros((1, d_model), jnp.float32),
        w1=u(ks[2], (d_ff, d_model), 1.0 / math.sqrt(d_model)),
        b1=u(ks[3], (1, d_ff), 1.0 / math.sqrt(d_model)),
        w2=u(ks[4], (d_model, d_ff), 1.0 / math.sqrt(d_ff)),
        b2=u(ks[5], (1, d_model), 1.0 / math.sqrt(d_ff)),
        # decoder: per init_weights(): weight ~ U(-0.1, 0.1), bias = 0
        w_dec=u(jax.random.PRNGKey(1), (1, d_model), 0.1),
        b_dec=jnp.zeros((1, 1), jnp.float32),
    )
    return params


def _const_spec(arr):
    """Constant index_map: block == full array, DMA'd once across grid steps."""
    ndim = arr.ndim
    return pl.BlockSpec(arr.shape, lambda b, _n=ndim: (0,) * _n)


@functools.partial(jax.jit, static_argnames=("num_heads",))
def time_series_model(src, params, *, num_heads=N_HEAD):
    """src: (S, B, D) float32 -> (S, B, 1) float32."""
    S, B, D = src.shape
    hd = D // num_heads
    scale = 1.0 / math.sqrt(hd)

    # Per-batch layout for the grid; the transpose is a cheap wrapper-side XLA op.
    src_b = jnp.transpose(src, (1, 0, 2)).astype(jnp.float32)    # (B, S, D)
    pe = positional_encoding(S, D)                               # (S, D), passed once

    # ----- pre-transpose / pre-fold all weights at trace time (no in-kernel .T) --
    w_qkv = params["w_in"].T                                     # (D, 3D): [Q | K | V]
    w_qkv = w_qkv.at[:, :D].multiply(scale)                      # fold 1/sqrt(hd) into Q
    b_qkv = params["b_in"].at[:, :D].multiply(scale)             # (1, 3D)
    wo_h = params["w_out"].T.reshape(num_heads, hd, D)           # (H, hd, D)
    bo = params["b_out"]                                         # (1, D)
    w1_t = params["w1"].T                                        # (D, D_FF)
    w2_t = params["w2"].T                                        # (D_FF, D)

    weight_args = (w_qkv, b_qkv, wo_h, bo,
                   params["ln1_g"], params["ln1_b"],
                   params["ln2_g"], params["ln2_b"],
                   w1_t, params["b1"], w2_t, params["b2"],
                   params["w_dec"], params["b_dec"])

    in_specs = ([pl.BlockSpec((None, S, D), lambda b: (b, 0, 0)),   # src: per-batch block
                 _const_spec(pe)]
                + [_const_spec(w) for w in weight_args])

    out = pl.pallas_call(
        functools.partial(encoder_kernel, num_heads=num_heads),
        out_shape=jax.ShapeDtypeStruct((B, 1, S), jnp.float32),
        grid=(B,),
        in_specs=in_specs,
        out_specs=pl.BlockSpec((None, 1, S), lambda b: (b, 0, 0)),
        compiler_params=pltpu.CompilerParams(
            dimension_semantics=("parallel",)),                  # megacore sharding (v7x)
    )(src_b, pe, *weight_args)

    # (B, 1, S) -> (S, B, 1); wrapper-side reshape/transpose only.
    return out.reshape(B, S).T.reshape(S, B, 1)


if __name__ == "__main__":
    key = jax.random.PRNGKey(0)
    k_src, k_par = jax.random.split(key)
    src = jax.random.normal(k_src, (SEQ, BATCH, D_MODEL), jnp.float32)
    params = init_params(k_par, D_MODEL, N_HEAD, D_FF)

    out = time_series_model(src, params, num_heads=N_HEAD)
    jax.block_until_ready(out)
    assert out.shape == (SEQ, BATCH, 1), out.shape
    assert bool(jnp.all(jnp.isfinite(out)))
    print("KERNEL_OK")
</pallas_src>

<mosaic_0001>
module attributes {stable_mosaic.version = 11 : i64} {
  func.func @encoder_kernel(%arg0: i32, %arg1: memref<1x8x32xf32, #tpu.memory_space<vmem>>, %arg2: memref<8x32xf32, #tpu.memory_space<vmem>>, %arg3: memref<32x96xf32, #tpu.memory_space<vmem>>, %arg4: memref<1x96xf32, #tpu.memory_space<vmem>>, %arg5: memref<2x16x32xf32, #tpu.memory_space<vmem>>, %arg6: memref<1x32xf32, #tpu.memory_space<vmem>>, %arg7: memref<1x32xf32, #tpu.memory_space<vmem>>, %arg8: memref<1x32xf32, #tpu.memory_space<vmem>>, %arg9: memref<1x32xf32, #tpu.memory_space<vmem>>, %arg10: memref<1x32xf32, #tpu.memory_space<vmem>>, %arg11: memref<32x64xf32, #tpu.memory_space<vmem>>, %arg12: memref<1x64xf32, #tpu.memory_space<vmem>>, %arg13: memref<64x32xf32, #tpu.memory_space<vmem>>, %arg14: memref<1x32xf32, #tpu.memory_space<vmem>>, %arg15: memref<1x32xf32, #tpu.memory_space<vmem>>, %arg16: memref<1x1xf32, #tpu.memory_space<vmem>>, %arg17: memref<1x1x8xf32, #tpu.memory_space<vmem>>) attributes {dimension_semantics = [#tpu.dimension_semantics<parallel>], iteration_bounds = array<i64: 2>, scalar_prefetch = 0 : i64, scratch_operands = 0 : i64, tpu.core_type = #tpu.core_type<tc>, window_params = [{transform_indices = @transform_0, window_bounds = array<i64: 1, 8, 32>}, {pipeline_mode = #tpu.pipeline_mode<synchronous>, transform_indices = @transform_1, window_bounds = array<i64: 8, 32>}, {pipeline_mode = #tpu.pipeline_mode<synchronous>, transform_indices = @transform_2, window_bounds = array<i64: 32, 96>}, {pipeline_mode = #tpu.pipeline_mode<synchronous>, transform_indices = @transform_3, window_bounds = array<i64: 1, 96>}, {pipeline_mode = #tpu.pipeline_mode<synchronous>, transform_indices = @transform_4, window_bounds = array<i64: 2, 16, 32>}, {pipeline_mode = #tpu.pipeline_mode<synchronous>, transform_indices = @transform_5, window_bounds = array<i64: 1, 32>}, {pipeline_mode = #tpu.pipeline_mode<synchronous>, transform_indices = @transform_6, window_bounds = array<i64: 1, 32>}, {pipeline_mode = #tpu.pipeline_mode<synchronous>, transform_indices = @transform_7, window_bounds = array<i64: 1, 32>}, {pipeline_mode = #tpu.pipeline_mode<synchronous>, transform_indices = @transform_8, window_bounds = array<i64: 1, 32>}, {pipeline_mode = #tpu.pipeline_mode<synchronous>, transform_indices = @transform_9, window_bounds = array<i64: 1, 32>}, {pipeline_mode = #tpu.pipeline_mode<synchronous>, transform_indices = @transform_10, window_bounds = array<i64: 32, 64>}, {pipeline_mode = #tpu.pipeline_mode<synchronous>, transform_indices = @transform_11, window_bounds = array<i64: 1, 64>}, {pipeline_mode = #tpu.pipeline_mode<synchronous>, transform_indices = @transform_12, window_bounds = array<i64: 64, 32>}, {pipeline_mode = #tpu.pipeline_mode<synchronous>, transform_indices = @transform_13, window_bounds = array<i64: 1, 32>}, {pipeline_mode = #tpu.pipeline_mode<synchronous>, transform_indices = @transform_14, window_bounds = array<i64: 1, 32>}, {pipeline_mode = #tpu.pipeline_mode<synchronous>, transform_indices = @transform_15, window_bounds = array<i64: 1, 1>}, {transform_indices = @transform_16, window_bounds = array<i64: 1, 1, 8>}]} {
    %c0 = arith.constant 0 : index
    %c0_0 = arith.constant 0 : index
    %c0_1 = arith.constant 0 : index
    %0 = vector.load %arg1[%c0, %c0_0, %c0_1] : memref<1x8x32xf32, #tpu.memory_space<vmem>>, vector<1x8x32xf32>
    %1 = vector.shape_cast %0 : vector<1x8x32xf32> to vector<8x32xf32>
    %c0_2 = arith.constant 0 : index
    %c0_3 = arith.constant 0 : index
    %2 = vector.load %arg2[%c0_2, %c0_3] : memref<8x32xf32, #tpu.memory_space<vmem>>, vector<8x32xf32>
    %3 = arith.addf %1, %2 : vector<8x32xf32>
    %4 = tpu.iota {dimensions = array<i32: 0>} : vector<8x8xi32>
    %5 = tpu.iota {dimensions = array<i32: 1>} : vector<8x8xi32>
    %6 = arith.cmpi sge, %4, %5 : vector<8x8xi32>
    %cst = arith.constant 0.000000e+00 : f32
    %cst_4 = arith.constant -1.000000e+30 : f32
    %7 = vector.broadcast %cst : f32 to vector<8x8xf32>
    %8 = vector.broadcast %cst_4 : f32 to vector<8x8xf32>
    %9 = arith.select %6, %7, %8 : vector<8x8xi1>, vector<8x8xf32>
    %c0_5 = arith.constant 0 : index
    %c0_6 = arith.constant 0 : index
    %10 = vector.load %arg3[%c0_5, %c0_6] : memref<32x96xf32, #tpu.memory_space<vmem>>, vector<32x96xf32>
    %cst_7 = arith.constant dense<0.000000e+00> : vector<8x96xf32>
    %11 = tpu.matmul %3, %10, %cst_7 {dimension_numbers = #tpu.dot_dimension_numbers<[1], [0], [0], [1], [0, 0, 1, 1], [], []>} : vector<8x32xf32>, vector<32x96xf32>, vector<8x96xf32> -> vector<8x96xf32>
    %c0_8 = arith.constant 0 : index
    %c0_9 = arith.constant 0 : index
    %12 = vector.load %arg4[%c0_8, %c0_9] : memref<1x96xf32, #tpu.memory_space<vmem>>, vector<1x96xf32>
    %13 = vector.broadcast %12 : vector<1x96xf32> to vector<8x96xf32>
    %14 = arith.addf %11, %13 : vector<8x96xf32>
    %15 = vector.extract_strided_slice %14 {offsets = [0, 0], sizes = [8, 16], strides = [1, 1]} : vector<8x96xf32> to vector<8x16xf32>
    %16 = vector.extract_strided_slice %14 {offsets = [0, 32], sizes = [8, 16], strides = [1, 1]} : vector<8x96xf32> to vector<8x16xf32>
    %17 = vector.extract_strided_slice %14 {offsets = [0, 64], sizes = [8, 16], strides = [1, 1]} : vector<8x96xf32> to vector<8x16xf32>
    %cst_10 = arith.constant dense<0.000000e+00> : vector<8x8xf32>
    %18 = tpu.matmul %15, %16, %cst_10 {dimension_numbers = #tpu.dot_dimension_numbers<[1], [1], [0], [0], [0, 0, 1, 0], [], []>} : vector<8x16xf32>, vector<8x16xf32>, vector<8x8xf32> -> vector<8x8xf32>
    %19 = arith.addf %18, %9 : vector<8x8xf32>
    %cst_11 = arith.constant dense<0xFF800000> : vector<8xf32>
    %20 = vector.multi_reduction <maximumf>, %19, %cst_11 [1] : vector<8x8xf32> to vector<8xf32>
    %21 = vector.shape_cast %20 : vector<8xf32> to vector<8x1xf32>
    %22 = vector.broadcast %21 : vector<8x1xf32> to vector<8x8xf32>
    %23 = arith.subf %19, %22 : vector<8x8xf32>
    %24 = math.exp %23 : vector<8x8xf32>
    %cst_12 = arith.constant dense<0.000000e+00> : vector<8xf32>
    %25 = vector.multi_reduction <add>, %24, %cst_12 [1] : vector<8x8xf32> to vector<8xf32>
    %26 = vector.shape_cast %25 : vector<8xf32> to vector<8x1xf32>
    %27 = tpu.reciprocal %26 {approx = true} : vector<8x1xf32> -> vector<8x1xf32>
    %28 = vector.broadcast %27 : vector<8x1xf32> to vector<8x8xf32>
    %29 = arith.mulf %24, %28 : vector<8x8xf32>
    %cst_13 = arith.constant dense<0.000000e+00> : vector<8x16xf32>
    %30 = tpu.matmul %29, %17, %cst_13 {dimension_numbers = #tpu.dot_dimension_numbers<[1], [0], [0], [1], [0, 0, 1, 1], [], []>} : vector<8x8xf32>, vector<8x16xf32>, vector<8x16xf32> -> vector<8x16xf32>
    %c0_14 = arith.constant 0 : index
    %c0_15 = arith.constant 0 : index
    %c0_16 = arith.constant 0 : index
    %31 = vector.load %arg5[%c0_14, %c0_15, %c0_16] : memref<2x16x32xf32, #tpu.memory_space<vmem>>, vector<1x16x32xf32>
    %32 = vector.shape_cast %31 : vector<1x16x32xf32> to vector<16x32xf32>
    %cst_17 = arith.constant dense<0.000000e+00> : vector<8x32xf32>
    %33 = tpu.matmul %30, %32, %cst_17 {dimension_numbers = #tpu.dot_dimension_numbers<[1], [0], [0], [1], [0, 0, 1, 1], [], []>} : vector<8x16xf32>, vector<16x32xf32>, vector<8x32xf32> -> vector<8x32xf32>
    %34 = vector.extract_strided_slice %14 {offsets = [0, 16], sizes = [8, 16], strides = [1, 1]} : vector<8x96xf32> to vector<8x16xf32>
    %35 = vector.extract_strided_slice %14 {offsets = [0, 48], sizes = [8, 16], strides = [1, 1]} : vector<8x96xf32> to vector<8x16xf32>
    %36 = vector.extract_strided_slice %14 {offsets = [0, 80], sizes = [8, 16], strides = [1, 1]} : vector<8x96xf32> to vector<8x16xf32>
    %cst_18 = arith.constant dense<0.000000e+00> : vector<8x8xf32>
    %37 = tpu.matmul %34, %35, %cst_18 {dimension_numbers = #tpu.dot_dimension_numbers<[1], [1], [0], [0], [0, 0, 1, 0], [], []>} : vector<8x16xf32>, vector<8x16xf32>, vector<8x8xf32> -> vector<8x8xf32>
    %38 = arith.addf %37, %9 : vector<8x8xf32>
    %cst_19 = arith.constant dense<0xFF800000> : vector<8xf32>
    %39 = vector.multi_reduction <maximumf>, %38, %cst_19 [1] : vector<8x8xf32> to vector<8xf32>
    %40 = vector.shape_cast %39 : vector<8xf32> to vector<8x1xf32>
    %41 = vector.broadcast %40 : vector<8x1xf32> to vector<8x8xf32>
    %42 = arith.subf %38, %41 : vector<8x8xf32>
    %43 = math.exp %42 : vector<8x8xf32>
    %cst_20 = arith.constant dense<0.000000e+00> : vector<8xf32>
    %44 = vector.multi_reduction <add>, %43, %cst_20 [1] : vector<8x8xf32> to vector<8xf32>
    %45 = vector.shape_cast %44 : vector<8xf32> to vector<8x1xf32>
    %46 = tpu.reciprocal %45 {approx = true} : vector<8x1xf32> -> vector<8x1xf32>
    %47 = vector.broadcast %46 : vector<8x1xf32> to vector<8x8xf32>
    %48 = arith.mulf %43, %47 : vector<8x8xf32>
    %cst_21 = arith.constant dense<0.000000e+00> : vector<8x16xf32>
    %49 = tpu.matmul %48, %36, %cst_21 {dimension_numbers = #tpu.dot_dimension_numbers<[1], [0], [0], [1], [0, 0, 1, 1], [], []>} : vector<8x8xf32>, vector<8x16xf32>, vector<8x16xf32> -> vector<8x16xf32>
    %c1 = arith.constant 1 : index
    %c0_22 = arith.constant 0 : index
    %c0_23 = arith.constant 0 : index
    %50 = vector.load %arg5[%c1, %c0_22, %c0_23] : memref<2x16x32xf32, #tpu.memory_space<vmem>>, vector<1x16x32xf32>
    %51 = vector.shape_cast %50 : vector<1x16x32xf32> to vector<16x32xf32>
    %cst_24 = arith.constant dense<0.000000e+00> : vector<8x32xf32>
    %52 = tpu.matmul %49, %51, %cst_24 {dimension_numbers = #tpu.dot_dimension_numbers<[1], [0], [0], [1], [0, 0, 1, 1], [], []>} : vector<8x16xf32>, vector<16x32xf32>, vector<8x32xf32> -> vector<8x32xf32>
    %53 = arith.addf %33, %52 : vector<8x32xf32>
    %c0_25 = arith.constant 0 : index
    %c0_26 = arith.constant 0 : index
    %54 = vector.load %arg6[%c0_25, %c0_26] : memref<1x32xf32, #tpu.memory_space<vmem>>, vector<1x32xf32>
    %55 = vector.broadcast %54 : vector<1x32xf32> to vector<8x32xf32>
    %56 = arith.addf %53, %55 : vector<8x32xf32>
    %57 = arith.addf %3, %56 : vector<8x32xf32>
    %c0_27 = arith.constant 0 : index
    %c0_28 = arith.constant 0 : index
    %58 = vector.load %arg7[%c0_27, %c0_28] : memref<1x32xf32, #tpu.memory_space<vmem>>, vector<1x32xf32>
    %c0_29 = arith.constant 0 : index
    %c0_30 = arith.constant 0 : index
    %59 = vector.load %arg8[%c0_29, %c0_30] : memref<1x32xf32, #tpu.memory_space<vmem>>, vector<1x32xf32>
    %cst_31 = arith.constant dense<0.000000e+00> : vector<8xf32>
    %60 = vector.multi_reduction <add>, %57, %cst_31 [1] : vector<8x32xf32> to vector<8xf32>
    %61 = vector.shape_cast %60 : vector<8xf32> to vector<8x1xf32>
    %cst_32 = arith.constant 3.200000e+01 : f32
    %62 = vector.broadcast %cst_32 : f32 to vector<8x1xf32>
    %63 = arith.divf %61, %62 : vector<8x1xf32>
    %64 = vector.broadcast %63 : vector<8x1xf32> to vector<8x32xf32>
    %65 = arith.subf %57, %64 : vector<8x32xf32>
    %66 = vector.broadcast %63 : vector<8x1xf32> to vector<8x32xf32>
    %67 = arith.subf %57, %66 : vector<8x32xf32>
    %68 = arith.mulf %65, %67 : vector<8x32xf32>
    %cst_33 = arith.constant dense<0.000000e+00> : vector<8xf32>
    %69 = vector.multi_reduction <add>, %68, %cst_33 [1] : vector<8x32xf32> to vector<8xf32>
    %70 = vector.shape_cast %69 : vector<8xf32> to vector<8x1xf32>
    %cst_34 = arith.constant 3.200000e+01 : f32
    %71 = vector.broadcast %cst_34 : f32 to vector<8x1xf32>
    %72 = arith.divf %70, %71 : vector<8x1xf32>
    %cst_35 = arith.constant 9.99999974E-6 : f32
    %73 = vector.broadcast %cst_35 : f32 to vector<8x1xf32>
    %74 = arith.addf %72, %73 : vector<8x1xf32>
    %75 = math.rsqrt %74 : vector<8x1xf32>
    %76 = vector.broadcast %63 : vector<8x1xf32> to vector<8x32xf32>
    %77 = arith.subf %57, %76 : vector<8x32xf32>
    %78 = vector.broadcast %75 : vector<8x1xf32> to vector<8x32xf32>
    %79 = arith.mulf %77, %78 : vector<8x32xf32>
    %80 = vector.broadcast %58 : vector<1x32xf32> to vector<8x32xf32>
    %81 = arith.mulf %79, %80 : vector<8x32xf32>
    %82 = vector.broadcast %59 : vector<1x32xf32> to vector<8x32xf32>
    %83 = arith.addf %81, %82 : vector<8x32xf32>
    %c0_36 = arith.constant 0 : index
    %c0_37 = arith.constant 0 : index
    %84 = vector.load %arg11[%c0_36, %c0_37] : memref<32x64xf32, #tpu.memory_space<vmem>>, vector<32x64xf32>
    %cst_38 = arith.constant dense<0.000000e+00> : vector<8x64xf32>
    %85 = tpu.matmul %83, %84, %cst_38 {dimension_numbers = #tpu.dot_dimension_numbers<[1], [0], [0], [1], [0, 0, 1, 1], [], []>} : vector<8x32xf32>, vector<32x64xf32>, vector<8x64xf32> -> vector<8x64xf32>
    %c0_39 = arith.constant 0 : index
    %c0_40 = arith.constant 0 : index
    %86 = vector.load %arg12[%c0_39, %c0_40] : memref<1x64xf32, #tpu.memory_space<vmem>>, vector<1x64xf32>
    %87 = vector.broadcast %86 : vector<1x64xf32> to vector<8x64xf32>
    %88 = arith.addf %85, %87 : vector<8x64xf32>
    %cst_41 = arith.constant 0.000000e+00 : f32
    %89 = vector.broadcast %cst_41 : f32 to vector<8x64xf32>
    %90 = arith.maximumf %88, %89 : vector<8x64xf32>
    %c0_42 = arith.constant 0 : index
    %c0_43 = arith.constant 0 : index
    %91 = vector.load %arg13[%c0_42, %c0_43] : memref<64x32xf32, #tpu.memory_space<vmem>>, vector<64x32xf32>
    %cst_44 = arith.constant dense<0.000000e+00> : vector<8x32xf32>
    %92 = tpu.matmul %90, %91, %cst_44 {dimension_numbers = #tpu.dot_dimension_numbers<[1], [0], [0], [1], [0, 0, 1, 1], [], []>} : vector<8x64xf32>, vector<64x32xf32>, vector<8x32xf32> -> vector<8x32xf32>
    %c0_45 = arith.constant 0 : index
    %c0_46 = arith.constant 0 : index
    %93 = vector.load %arg14[%c0_45, %c0_46] : memref<1x32xf32, #tpu.memory_space<vmem>>, vector<1x32xf32>
    %94 = vector.broadcast %93 : vector<1x32xf32> to vector<8x32xf32>
    %95 = arith.addf %92, %94 : vector<8x32xf32>
    %96 = arith.addf %83, %95 : vector<8x32xf32>
    %c0_47 = arith.constant 0 : index
    %c0_48 = arith.constant 0 : index
    %97 = vector.load %arg9[%c0_47, %c0_48] : memref<1x32xf32, #tpu.memory_space<vmem>>, vector<1x32xf32>
    %c0_49 = arith.constant 0 : index
    %c0_50 = arith.constant 0 : index
    %98 = vector.load %arg10[%c0_49, %c0_50] : memref<1x32xf32, #tpu.memory_space<vmem>>, vector<1x32xf32>
    %cst_51 = arith.constant dense<0.000000e+00> : vector<8xf32>
    %99 = vector.multi_reduction <add>, %96, %cst_51 [1] : vector<8x32xf32> to vector<8xf32>
    %100 = vector.shape_cast %99 : vector<8xf32> to vector<8x1xf32>
    %cst_52 = arith.constant 3.200000e+01 : f32
    %101 = vector.broadcast %cst_52 : f32 to vector<8x1xf32>
    %102 = arith.divf %100, %101 : vector<8x1xf32>
    %103 = vector.broadcast %102 : vector<8x1xf32> to vector<8x32xf32>
    %104 = arith.subf %96, %103 : vector<8x32xf32>
    %105 = vector.broadcast %102 : vector<8x1xf32> to vector<8x32xf32>
    %106 = arith.subf %96, %105 : vector<8x32xf32>
    %107 = arith.mulf %104, %106 : vector<8x32xf32>
    %cst_53 = arith.constant dense<0.000000e+00> : vector<8xf32>
    %108 = vector.multi_reduction <add>, %107, %cst_53 [1] : vector<8x32xf32> to vector<8xf32>
    %109 = vector.shape_cast %108 : vector<8xf32> to vector<8x1xf32>
    %cst_54 = arith.constant 3.200000e+01 : f32
    %110 = vector.broadcast %cst_54 : f32 to vector<8x1xf32>
    %111 = arith.divf %109, %110 : vector<8x1xf32>
    %cst_55 = arith.constant 9.99999974E-6 : f32
    %112 = vector.broadcast %cst_55 : f32 to vector<8x1xf32>
    %113 = arith.addf %111, %112 : vector<8x1xf32>
    %114 = math.rsqrt %113 : vector<8x1xf32>
    %115 = vector.broadcast %102 : vector<8x1xf32> to vector<8x32xf32>
    %116 = arith.subf %96, %115 : vector<8x32xf32>
    %117 = vector.broadcast %114 : vector<8x1xf32> to vector<8x32xf32>
    %118 = arith.mulf %116, %117 : vector<8x32xf32>
    %119 = vector.broadcast %97 : vector<1x32xf32> to vector<8x32xf32>
    %120 = arith.mulf %118, %119 : vector<8x32xf32>
    %121 = vector.broadcast %98 : vector<1x32xf32> to vector<8x32xf32>
    %122 = arith.addf %120, %121 : vector<8x32xf32>
    %c0_56 = arith.constant 0 : index
    %c0_57 = arith.constant 0 : index
    %123 = vector.load %arg15[%c0_56, %c0_57] : memref<1x32xf32, #tpu.memory_space<vmem>>, vector<1x32xf32>
    %cst_58 = arith.constant dense<0.000000e+00> : vector<1x8xf32>
    %124 = tpu.matmul %123, %122, %cst_58 {dimension_numbers = #tpu.dot_dimension_numbers<[1], [1], [0], [0], [0, 0, 1, 0], [], []>} : vector<1x32xf32>, vector<8x32xf32>, vector<1x8xf32> -> vector<1x8xf32>
    %c0_59 = arith.constant 0 : index
    %c0_60 = arith.constant 0 : index
    %125 = vector.load %arg16[%c0_59, %c0_60] : memref<1x1xf32, #tpu.memory_space<vmem>>, vector<1x1xf32>
    %126 = vector.broadcast %125 : vector<1x1xf32> to vector<1x8xf32>
    %127 = arith.addf %124, %126 : vector<1x8xf32>
    %c0_61 = arith.constant 0 : index
    %c0_62 = arith.constant 0 : index
    %c0_63 = arith.constant 0 : index
    %128 = vector.load %arg17[%c0_61, %c0_62, %c0_63] : memref<1x1x8xf32, #tpu.memory_space<vmem>>, vector<1x1x8xf32>
    %129 = vector.shape_cast %128 : vector<1x1x8xf32> to vector<1x8xf32>
    %130 = vector.shape_cast %127 : vector<1x8xf32> to vector<1x1x8xf32>
    tpu.vector_store %arg17[%c0_61, %c0_62, %c0_63], %130 {strides = array<i32>} : memref<1x1x8xf32, #tpu.memory_space<vmem>>, vector<1x1x8xf32>,
    return
  }
  func.func @transform_0(%arg0: i32) -> (i32, i32, i32) {
    %c0_i32 = arith.constant 0 : i32
    %c0_i32_0 = arith.constant 0 : i32
    %c0_i32_1 = arith.constant 0 : i32
    return %arg0, %c0_i32, %c0_i32_0 : i32, i32, i32
  }
  func.func @transform_1(%arg0: i32) -> (i32, i32) {
    %c0_i32 = arith.constant 0 : i32
    %c0_i32_0 = arith.constant 0 : i32
    %c0_i32_1 = arith.constant 0 : i32
    return %c0_i32, %c0_i32_0 : i32, i32
  }
  func.func @transform_2(%arg0: i32) -> (i32, i32) {
    %c0_i32 = arith.constant 0 : i32
    %c0_i32_0 = arith.constant 0 : i32
    %c0_i32_1 = arith.constant 0 : i32
    return %c0_i32, %c0_i32_0 : i32, i32
  }
  func.func @transform_3(%arg0: i32) -> (i32, i32) {
    %c0_i32 = arith.constant 0 : i32
    %c0_i32_0 = arith.constant 0 : i32
    %c0_i32_1 = arith.constant 0 : i32
    return %c0_i32, %c0_i32_0 : i32, i32
  }
  func.func @transform_4(%arg0: i32) -> (i32, i32, i32) {
    %c0_i32 = arith.constant 0 : i32
    %c0_i32_0 = arith.constant 0 : i32
    %c0_i32_1 = arith.constant 0 : i32
    %c0_i32_2 = arith.constant 0 : i32
    return %c0_i32, %c0_i32_0, %c0_i32_1 : i32, i32, i32
  }
  func.func @transform_5(%arg0: i32) -> (i32, i32) {
    %c0_i32 = arith.constant 0 : i32
    %c0_i32_0 = arith.constant 0 : i32
    %c0_i32_1 = arith.constant 0 : i32
    return %c0_i32, %c0_i32_0 : i32, i32
  }
  func.func @transform_6(%arg0: i32) -> (i32, i32) {
    %c0_i32 = arith.constant 0 : i32
    %c0_i32_0 = arith.constant 0 : i32
    %c0_i32_1 = arith.constant 0 : i32
    return %c0_i32, %c0_i32_0 : i32, i32
  }
  func.func @transform_7(%arg0: i32) -> (i32, i32) {
    %c0_i32 = arith.constant 0 : i32
    %c0_i32_0 = arith.constant 0 : i32
    %c0_i32_1 = arith.constant 0 : i32
    return %c0_i32, %c0_i32_0 : i32, i32
  }
  func.func @transform_8(%arg0: i32) -> (i32, i32) {
    %c0_i32 = arith.constant 0 : i32
    %c0_i32_0 = arith.constant 0 : i32
    %c0_i32_1 = arith.constant 0 : i32
    return %c0_i32, %c0_i32_0 : i32, i32
  }
  func.func @transform_9(%arg0: i32) -> (i32, i32) {
    %c0_i32 = arith.constant 0 : i32
    %c0_i32_0 = arith.constant 0 : i32
    %c0_i32_1 = arith.constant 0 : i32
    return %c0_i32, %c0_i32_0 : i32, i32
  }
  func.func @transform_10(%arg0: i32) -> (i32, i32) {
    %c0_i32 = arith.constant 0 : i32
    %c0_i32_0 = arith.constant 0 : i32
    %c0_i32_1 = arith.constant 0 : i32
    return %c0_i32, %c0_i32_0 : i32, i32
  }
  func.func @transform_11(%arg0: i32) -> (i32, i32) {
    %c0_i32 = arith.constant 0 : i32
    %c0_i32_0 = arith.constant 0 : i32
    %c0_i32_1 = arith.constant 0 : i32
    return %c0_i32, %c0_i32_0 : i32, i32
  }
  func.func @transform_12(%arg0: i32) -> (i32, i32) {
    %c0_i32 = arith.constant 0 : i32
    %c0_i32_0 = arith.constant 0 : i32
    %c0_i32_1 = arith.constant 0 : i32
    return %c0_i32, %c0_i32_0 : i32, i32
  }
  func.func @transform_13(%arg0: i32) -> (i32, i32) {
    %c0_i32 = arith.constant 0 : i32
    %c0_i32_0 = arith.constant 0 : i32
    %c0_i32_1 = arith.constant 0 : i32
    return %c0_i32, %c0_i32_0 : i32, i32
  }
  func.func @transform_14(%arg0: i32) -> (i32, i32) {
    %c0_i32 = arith.constant 0 : i32
    %c0_i32_0 = arith.constant 0 : i32
    %c0_i32_1 = arith.constant 0 : i32
    return %c0_i32, %c0_i32_0 : i32, i32
  }
  func.func @transform_15(%arg0: i32) -> (i32, i32) {
    %c0_i32 = arith.constant 0 : i32
    %c0_i32_0 = arith.constant 0 : i32
    %c0_i32_1 = arith.constant 0 : i32
    return %c0_i32, %c0_i32_0 : i32, i32
  }
  func.func @transform_16(%arg0: i32) -> (i32, i32, i32) {
    %c0_i32 = arith.constant 0 : i32
    %c0_i32_0 = arith.constant 0 : i32
    %c0_i32_1 = arith.constant 0 : i32
    return %arg0, %c0_i32, %c0_i32_0 : i32, i32, i32
  }
}

</mosaic_0001>

<bundles_post_ra>
// kernel: time_series_model.1
= control target key start
LH: loop header
LB: loop body
LE: loop exit
PB: predicated region body
PF: predicated region fallthrough
CT: control target
= control target key end

     0   :  { %s2148_s0 = inlined_call_operand.vmem [shape: f32[2,8,32], index: 0, kind: input, shape index: {}]   ;;  %s2149_s1 = inlined_call_operand.vmem [shape: f32[8,32], index: 1, kind: input, shape index: {}]   ;;  %s2150_s2 = inlined_call_operand.vmem [shape: f32[32,96], index: 2, kind: input, shape index: {}]   ;;  %s2151_s3 = inlined_call_operand.vmem [shape: f32[1,96], index: 3, kind: input, shape index: {}]   ;;  %s2152_s4 = inlined_call_operand.vmem [shape: f32[2,16,32], index: 4, kind: input, shape index: {}]   ;;  %s2153_s5 = inlined_call_operand.vmem [shape: f32[1,32], index: 5, kind: input, shape index: {}]   ;;  %s2154_s6 = inlined_call_operand.vmem [shape: f32[1,32], index: 6, kind: input, shape index: {}]   ;;  %s2155_s7 = inlined_call_operand.vmem [shape: f32[1,32], index: 7, kind: input, shape index: {}]   ;;  %s2156_s8 = inlined_call_operand.vmem [shape: f32[1,32], index: 8, kind: input, shape index: {}]   ;;  %s2157_s9 = inlined_call_operand.vmem [shape: f32[1,32], index: 9, kind: input, shape index: {}]   ;;  %s2158_s10 = inlined_call_operand.vmem [shape: f32[32,64], index: 10, kind: input, shape index: {}]   ;;  %s2159_s11 = inlined_call_operand.vmem [shape: f32[1,64], index: 11, kind: input, shape index: {}]   ;;  %s2160_s12 = inlined_call_operand.vmem [shape: f32[64,32], index: 12, kind: input, shape index: {}]   ;;  %s2161_s13 = inlined_call_operand.vmem [shape: f32[1,32], index: 13, kind: input, shape index: {}]   ;;  %s2162_s14 = inlined_call_operand.vmem [shape: f32[1,32], index: 14, kind: input, shape index: {}]   ;;  %s2163_s15 = inlined_call_operand.<no memory space> [shape: f32[1,1], index: 15, kind: input, shape index: {}]   ;;  %s2164_s16 = inlined_call_operand.hbm [shape: f32[2,1,8], index: 16, kind: output, shape index: {}]  }
   0x1   :  { %2165 = sst [smem:[#allocation7_spill]] %s2148_s0  ;;  %v21_v0 = vstv %s2163_s15 }
   0x2   :  { %2166 = sst [smem:[#allocation8_spill]] %s2149_s1  ;;  %22 = vst [vmem:[#allocation2] sm:$0x1] %v21_v0 }
   0x3   :  { %2167 = sst [smem:[#allocation9_spill]] %s2150_s2 }
   0x4   :  { %2168 = sst [smem:[#allocation10_spill]] %s2151_s3 }
   0x5   :  { %23 = vsyncpa [#allocation4], 0 }
   0x6   :  { %25 = vsyncpa [#allocation4 + $0x1], 0  ;;  %s1895_s23 = smov 0   ;;  %s1897_s24 = smov 0  }
   0x7   :  { %s1899_s25 = smov 0   ;;  %s1901_s26 = smov 0  }
   0x8 LB: > { %s1916_s15 = sadd.s32 4294967295, %s1794_s26   ;;  %s1494_s27 = sadd.s32 4294967294, %s1794_s26   ;;  %s1794_s26 = sphi %s1901_s26, %s2180_s26   ;;  %s1790_s25 = sphi %s1899_s25, %s2179_s25   ;;  %s1786_s24 = sphi %s1897_s24, %s2178_s24   ;;  %s1782_s23 = sphi %s1895_s23, %s2177_s23  }
   0x9   : > { %s1920_s28 = sadd.s32 1, %s1794_s26   ;;  %s379_s29 = sadd.s32 1, %s1790_s25 }
   0xa   : > { %s376_s30 = ssub.s32 %s1794_s26, %s1920_s28  ;;  %p389_p0 = scmp.ne.s32.totalorder %s1790_s25, %s1786_s24 }
   0xb   : > { %p377_p1 = scmp.eq.s32.totalorder %s376_s30, 0  ;;  %p390_p2 = scmp.eq.s32.totalorder %s1916_s15, 1 }
   0xc   : > { %p395_p3 = scmp.ne.s32.totalorder %s1786_s24, %s1782_s23  ;;  %p396_p4 = scmp.eq.s32.totalorder %s1494_s27, 1 }
   0xd   : > { %s1931_s0 = scalar_select %p377_p1, %s1790_s25, %s379_s29  }
   0xe   : > { %p1933_p5 = por %p390_p2, %p389_p0  ;;  %p1937_p6 = por %p396_p4, %p395_p3 }
   0xf   : > { %2169 = sst [smem:[#allocation6_spill]] %s1931_s0  ;;  %p1497_p7 = scmp.ge.s32.totalorder %s1794_s26, 1 }
  0x10   : > { %p466_p8 = scmp.lt.s32.totalorder %s1794_s26, 3 }
  0x12   : > { %p467_p9 = pnand %p1497_p7, %p466_p8 }
  0x13   : > { %s2172_s2 = sld [smem:[#allocation9_spill]] (!%p467_p9)  ;;  %v1796_v4 = vmov (!%p467_p9), 0.0|0.0   ;;  %vm1797_vm0 = vmmov (!%p467_p9), 0   ;;  %v1798_v7 = vmov (!%p467_p9), 0.0   ;;  %p514_p10 = scmp.lt.s32.totalorder (!%p467_p9), %s1916_s15, 1  ;;  %vm538_vm1 = vcmask (!%p467_p9), 261120  }
  0x14   : > { %470 = sbr.rel (%p467_p9) target bundleno = 2618 (0xa3a), region = 84  ;;  %1640 = vmatprep.subr.bf16.mxu0 (!%p467_p9), %v1796_v4  ;;  %1568 = vmatprep.mubr.msk.f32.mxu0 (!%p467_p9), %vm1797_vm0, %v1798_v7  ;;  %s2173_s1 = sld [smem:[#allocation8_spill]] (!%p467_p9)  ;;  %vm615_vm2 = vcmask (!%p467_p9), 130048   ;;  %v521_v19 = vlaneseq (!%p467_p9)  ;;  %v1802_v22 = vmov (!%p467_p9), -1e+30   ;;  %vm690_vm4 = vcmask (!%p467_p9), 64512  }
  0x15   : > { %1571 = vmatprep.subr.mxu1 (!%p467_p9), %v1798_v7  ;;  %1573 = vmatprep.mubr.msk.f32.mxu1 (!%p467_p9), %vm1797_vm0, %v1798_v7  ;;  %s2174_s29 = sld [smem:[#allocation7_spill]] (!%p467_p9)  ;;  %s2175_s3 = sld [smem:[#allocation10_spill]] (!%p467_p9)  ;;  %v778_v47 = vld [vmem:[%s2152_s4] sm:$0xff] (!%p467_p9)  ;;  %v779_v48 = vld [vmem:[%s2152_s4 + $0x8] sm:$0xff] (!%p467_p9)  ;;  %v1507_v53 = vld [vmem:[%s2152_s4 + $0x10] sm:$0xff] (!%p467_p9)  ;;  %vm1233_vm5 = vcmask (!%p467_p9), 523264  }
  0x16   : > { %s1800_s0 = smov (!%p467_p9), 96   ;;  %s1801_s22 = smov (!%p467_p9), 80   ;;  %v1990_v20 = vshrl.u32 (!%p467_p9), %v521_v19, 7  ;;  %v524_v21 = vand.u32 (!%p467_p9), 127, %v521_v19  ;;  %v1650_v51 = vpack.c.bf16 (!%p467_p9), %v779_v48, %v778_v47  ;;  %v1508_v54 = vld [vmem:[%s2152_s4 + $0x18] sm:$0xff] (!%p467_p9)  ;;  %v1219_v19 = vld [vmem:[%s2160_s12 + $0x8] sm:$0xff] (!%p467_p9) }
  0x17   : > { %s1803_s27 = smov (!%p467_p9), 48   ;;  %v1647_v55 = vpack.c.bf16 (!%p467_p9), %v1508_v54, %v1507_v53  ;;  %v1511_v63 = vld [vmem:[%s2153_s5] ss:$0 sm:$0xff] (!%p467_p9)  ;;  %vm1424_vm6 = vcmask (!%p467_p9), 57344  }
  0x18   : > { %vm525_vm3 = vcmp.ge.s32.totalorder (!%p467_p9), %v1990_v20, %v524_v21  ;;  %v1220_v21 = vld [vmem:[%s2160_s12 + $0x10] sm:$0xff] (!%p467_p9)  ;;  %v1338_v54 = vld [vmem:[#allocation2] sm:$0x1] (!%p467_p9) }
  0x19   : > { %v527_v1 = vld [vmem:[%s2172_s2] sm:$0xff] (!%p467_p9)  ;;  %v528_v2 = vld [vmem:[%s2172_s2 + $0x8] sm:$0xff] (!%p467_p9)  ;;  %v529_v3 = vld [vmem:[%s2172_s2 + $0x10] sm:$0xff] (!%p467_p9)  ;;  %v526_v23 = vsel (!%p467_p9), %vm525_vm3, 0.0, %v1802_v22 }
  0x1a   : > { %v1641_v5 = vpack.c.bf16 (!%p467_p9), %v528_v2, %v527_v1  ;;  %v530_v6 = vld [vmem:[%s2172_s2 + $0x18] sm:$0xff] (!%p467_p9)  ;;  %v519_v9 = vld [vmem:[%s2173_s1] sm:$0xff] (!%p467_p9) }
  0x1b   : > { %v1644_v8 = vpack.c.bf16 %v530_v6, %v529_v3  ;;  %s515_s19 = scalar_select %p514_p10, %s1916_s15, 1  ;;  %v1499_v12 = vld [vmem:[%s2175_s3] ss:$0 sm:$0xff] }
  0x1c   : > { %1642 = vmatpush3.bf16.msra.mxu0 %v1641_v5 }
  0x1d   : > { %1643 = vmatprep.subr.bf16.mxu0 %v1796_v4  ;;  %s1498_s20 = sshll.u32 %s515_s19, 3 }
  0x1e   : > { %s517_s30 = scalar_lea.vmem %s2174_s29, %s1498_s20  ;;  %s1799_s20 = smov 112  }
  0x1f   : > { %v518_v10 = vld [vmem:[%s517_s30] sm:$0xff]  ;;  %s1804_s29 = smov 64  }
  0x20   : > { %1645 = vmatpush3.bf16.msra.mxu0 %v1644_v8  ;;  %v1970_v11 = vadd.f32 %v519_v9, %v518_v10 }
  0x21   : > { %1581 = vmatprep.subr.mxu0 %v1798_v7 }
  0x23   : > { %1569 = vmatmul.mubr.msk.f32.vlgmr.msra.gmra.mrb[0].mxu0 %vm538_vm1, %v1970_v11 }
  0x24   : > { %1583 = vmatprep.mubr.msk.f32.mxu0 %vm1797_vm0, %v1798_v7 }
  0xf6   : > { %v608_v13 = vpop.f32.mrb[0].mxu0 }
  0xf7   : > { %v609_v14 = vadd.f32 %v1499_v12, %v608_v13  ;;  %v1570_v15 = vpop.f32.mrb[1].mxu0  ;;  %v1133_v13 = vld [vmem:[%s2158_s10] sm:$0xff] }
  0xf9   : > { %780 = vrot.lane.b32.xlu1 %v609_v14, %s1799_s20  ;;  %613 = vrot.lane.b32.xlu0 %v609_v14, %s1800_s0 }
  0xfd   : > { %782 = vrot.lane.b32.xlu0 %v609_v14, %s1801_s22  ;;  %s512_s22 = sand.u32 1, %s1786_s24  }
  0xfe   : > { %s513_s1 = scalar_lea.vmem [#allocation3], %s512_s22  ;;  %s1427_s20 = scalar_lea.sflag [#allocation4], %s512_s22 }
 0x16b   : > { %v614_v16 = vpop.permute.xlu0 %613  ;;  %v781_v18 = vpop.permute.xlu1 %780 }
 0x16c   : > { %1572 = vmatpush3.xpose.msk.msra.mxu1 %vm615_vm2, %v614_v16  ;;  %v1136_v16 = vld [vmem:[%s2158_s10 + $0x18] sm:$0xff] }
 0x16d   : > { %1576 = vmatprep.subr.mxu1 %v1798_v7 }
 0x16f   : > { %1574 = vmatmul.mubr.msk.f32.vlgmr.msra.gmra.mrb[0].mxu1 %vm615_vm2, %v609_v14  ;;  %v783_v17 = vpop.permute.xlu0 %782 }
 0x170   : > { %1582 = vmatpush3.xpose.msk.msra.mxu0 %vm615_vm2, %v783_v17  ;;  %1578 = vmatprep.mubr.msk.f32.mxu1 %vm1797_vm0, %v1798_v7 }
 0x171   : > { %1646 = vmatprep.subr.bf16.mxu0 %v1796_v4 }
 0x173   : > { %1584 = vmatmul.mubr.msk.f32.vlgmr.msra.gmra.mrb[2].mxu0 %vm615_vm2, %v781_v18  ;;  %v1218_v18 = vld [vmem:[%s2160_s12] sm:$0xff] }
 0x174   : > { %1595 = vmatprep.mubr.msk.f32.mxu0 %vm1797_vm0, %v1798_v7  ;;  %1648 = vmatpush3.bf16.msra.mxu0 %v1647_v55  ;;  %v1659_v22 = vpack.c.bf16 %v1219_v19, %v1218_v18  ;;  %v1805_v55 = vmov 0  }
 0x175   : > { %1652 = vmatprep.subr.bf16.mxu0 %v1796_v4  ;;  %1719 = vset.pattern.permute.xlu0 %v1805_v55 }
 0x242   : > { %v686_v24 = vpop.f32.mrb[0].mxu1 }
 0x243   : > { %v687_v25 = vadd.f32 %v686_v24, %v526_v23  ;;  %v1575_v26 = vpop.f32.mrb[1].mxu1 }
 0x244   : > { %v1223_v26 = vld [vmem:[%s2160_s12 + $0x28] sm:$0xff] }
 0x245   : > { %v691_v27 = vsel %vm690_vm4, %v687_v25, -inf }
 0x246   : > { %692 = vmax.xlane.f32.xlu1 %v691_v27  ;;  %v854_v28 = vpop.f32.mrb[2].mxu0 }
 0x247   : > { %v855_v29 = vadd.f32 %v854_v28, %v526_v23  ;;  %v1585_v30 = vpop.f32.mrb[3].mxu0  ;;  %v1221_v23 = vld [vmem:[%s2160_s12 + $0x18] sm:$0xff] }
 0x248   : > { %v1662_v24 = vpack.c.bf16 %v1221_v23, %v1220_v21 }
 0x249   : > { %v858_v31 = vsel %vm690_vm4, %v855_v29, -inf }
 0x24a   : > { %859 = vmax.xlane.f32.xlu0 %v858_v31 }
 0x2d3   : > { %v693_v32 = vpop.xlane.xlu1 %692 }
 0x2d4   : > { %v694_v33 = vsub.f32 %v687_v25, %v693_v32  ;;  %v1222_v25 = vld [vmem:[%s2160_s12 + $0x20] sm:$0xff] }
 0x2d5   : > { %v1665_v27 = vpack.c.bf16 %v1223_v26, %v1222_v25  ;;  %v1512_v32 = vld [vmem:[%s2154_s6] ss:$0 sm:$0xff] }
 0x2d6   : > { %v695_v34 = vmul.f32 1.442695, %v694_v33 }
 0x2d7   : > { %v860_v35 = vpop.xlane.xlu0 %859 }
 0x2d8   : > { %1720 = vpow2.f32 %v695_v34  ;;  %v861_v36 = vsub.f32 %v855_v29, %v860_v35  ;;  %v1513_v34 = vld [vmem:[%s2155_s7] ss:$0 sm:$0xff] }
 0x2da   : > { %v862_v37 = vmul.f32 1.442695, %v861_v36 }
 0x2dc   : > { %1722 = vpow2.f32 %v862_v37  ;;  %v1225_v37 = vld [vmem:[%s2160_s12 + $0x38] sm:$0xff] }
 0x2e2   : > { %v1721_v38 = vpop.eup %1720 }
 0x2e3   : > { %v697_v39 = vsel %vm690_vm4, %v1721_v38, 0.0 }
 0x2e4   : > { %698 = vadd.xlane.f32.xlu0 %v697_v39  ;;  %v1514_v39 = vld [vmem:[%s2159_s11] ss:$0 sm:$0xff] }
 0x2e6   : > { %v1723_v40 = vpop.eup %1722 }
 0x2e7   : > { %v864_v41 = vsel %vm690_vm4, %v1723_v40, 0.0 }
 0x2e8   : > { %865 = vadd.xlane.f32.xlu1 %v864_v41 }
 0x2f9   : > { %869 = vrot.lane.b32.xlu1 %v609_v14, %s1803_s27  ;;  %s1522_s27 = sshll.u32 %s1916_s15, 4  ;;  %s1806_s15 = smov [#allocation3]  }
 0x2fa   : > { %702 = vrot.lane.b32.xlu0 %v609_v14, %s1804_s29  ;;  %v1134_v14 = vld [vmem:[%s2158_s10 + $0x8] sm:$0xff]  ;;  %s1439_s29 = sshll.u32 %s513_s1, 4  ;;  %s2106_s21 = scalar_lea.hbm %s2164_s16, %s1522_s27  ;;  %s2108_s29 = int_to_ptr.vmem [resolvable:$true] %s1439_s29 }
 0x2fb   : > { %v1653_v15 = vpack.c.bf16 %v1134_v14, %v1133_v13  ;;  %s1732_s0 = scalar_lea.vmem %s2108_s29, 16  ;;  %s1736_s2 = sshll.u32 %s1806_s15, 4  ;;  %s1737_s2 = int_to_ptr.vmem [resolvable:$false] %s1736_s2 }
 0x2fc   : > { %p1733_p11 = scmp.ne.s32.totalorder %s2108_s29, %s1732_s0  ;;  %s1738_s3 = scalar_lea.vmem %s1737_s2, 32 }
 0x2fd   : > { %p1739_p0 = scmp.lt.s32.totalorder %s2108_s29, %s1737_s2  ;;  %p1740_p1 = scmp.lt.s32.totalorder %s1738_s3, %s1732_s0 }
 0x2fe   : > { %p1734_p12 = pnand %p1733_p11, %p1933_p5 }
 0x2ff   : > { %p1741_p2 = por %p1740_p1, %p1739_p0 }
 0x300   : > { %p1735_p13 = pneg %p1734_p12 }
 0x302   : > { %p1742_p3 = pnand %p1741_p2, %p1735_p13 }
 0x371   : > { %v699_v42 = vpop.xlane.xlu0 %698 }
 0x372   : > { %1724 = vrcp.f32 %v699_v42 }
 0x375   : > { %v866_v43 = vpop.xlane.xlu1 %865  ;;  %v703_v44 = vpop.permute.xlu0 %702 }
 0x376   : > { %1726 = vrcp.f32 %v866_v43  ;;  %1577 = vmatpush3.msra.mxu1 %v703_v44 }
 0x377   : > { %1586 = vmatprep.subr.mxu1 %v1798_v7 }
 0x379   : > { %v870_v49 = vpop.permute.xlu1 %869 }
 0x37c   : > { %v1725_v45 = vpop.eup %1724 }
 0x37d   : > { %v701_v46 = vmul.f32 %v1725_v45, %v1721_v38 }
 0x37f   : > { %1579 = vmatmul.mubr.msk.f32.vlgmr.msra.gmra.mrb[2].mxu1 %vm690_vm4, %v701_v46 }
 0x380   : > { %v1727_v50 = vpop.eup %1726  ;;  %1587 = vmatpush3.msra.mxu1 %v870_v49  ;;  %1588 = vmatprep.mubr.msk.f32.mxu1 %vm1797_vm0, %v1798_v7 }
 0x381   : > { %v868_v52 = vmul.f32 %v1727_v50, %v1723_v40  ;;  %1649 = vmatprep.subr.bf16.mxu1 %v1796_v4 }
 0x383   : > { %1589 = vmatmul.mubr.msk.f32.vlgmr.msra.gmra.mrb[4].mxu1 %vm690_vm4, %v868_v52 }
 0x384   : > { %1651 = vmatpush3.bf16.msra.mxu1 %v1650_v51  ;;  %1602 = vmatprep.mubr.msk.f32.mxu1 %vm1797_vm0, %v1798_v7 }
 0x385   : > { %1658 = vmatprep.subr.bf16.mxu1 %v1796_v4 }
 0x452   : > { %v774_v56 = vpop.f32.mrb[2].mxu1 }
 0x453   : > { %v1580_v57 = vpop.f32.mrb[3].mxu1  ;;  %1603 = vmatmul.mubr.msk.f32.vlgmr.msra.gmra.mrb[6].mxu1 %vm615_vm2, %v774_v56 }
 0x454   : > { %1632 = vmatprep.mubr.msk.f32.mxu1 %vm1797_vm0, %v1798_v7  ;;  %1660 = vmatpush3.bf16.msra.mxu1 %v1659_v22 }
 0x455   : > { %1661 = vmatprep.subr.bf16.mxu1 %v1796_v4 }
 0x456   : > { %v941_v58 = vpop.f32.mrb[4].mxu1 }
 0x457   : > { %v1590_v59 = vpop.f32.mrb[5].mxu1  ;;  %1596 = vmatmul.mubr.msk.f32.vlgmr.msra.gmra.mrb[4].mxu0 %vm615_vm2, %v941_v58 }
 0x458   : > { %1613 = vmatprep.mubr.msk.f32.mxu0 %vm1797_vm0, %v1798_v7  ;;  %1654 = vmatpush3.bf16.msra.mxu0 %v1653_v15 }
 0x459   : > { %1655 = vmatprep.subr.bf16.mxu0 %v1796_v4  ;;  %1663 = vmatpush3.bf16.msra.mxu1 %v1662_v24 }
 0x45a   : > { %1664 = vmatprep.subr.bf16.mxu1 %v1796_v4 }
 0x45d   : > { %1666 = vmatpush3.bf16.msra.mxu1 %v1665_v27 }
 0x45e   : > { %1667 = vmatprep.subr.bf16.mxu1 %v1796_v4  ;;  %v1224_v4 = vld [vmem:[%s2160_s12 + $0x30] sm:$0xff] }
 0x45f   : > { %v1668_v38 = vpack.c.bf16 %v1225_v37, %v1224_v4 }
 0x461   : > { %1669 = vmatpush3.bf16.msra.mxu1 %v1668_v38 }
 0x526   : > { %v1090_v60 = vpop.f32.mrb[6].mxu1 }
 0x527   : > { %v1604_v61 = vpop.f32.mrb[7].mxu1 }
 0x52a   : > { %v1017_v62 = vpop.f32.mrb[4].mxu0 }
 0x52b   : > { %v1091_v0 = vadd.f32 %v1090_v60, %v1017_v62  ;;  %v1597_v1 = vpop.f32.mrb[5].mxu0  ;;  %v1518_v60 = vld [vmem:[%s2156_s8] ss:$0 sm:$0xff] }
 0x52c   : > { %v1519_v62 = vld [vmem:[%s2157_s9] ss:$0 sm:$0xff] }
 0x52d   : > { %v1101_v2 = vadd.f32 %v1511_v63, %v1091_v0  ;;  %v1337_v1 = vld [vmem:[%s2162_s14] sm:$0x1] }
 0x52f   : > { %v1102_v3 = vadd.f32 %v1101_v2, %v1970_v11  ;;  %v1135_v11 = vld [vmem:[%s2158_s10 + $0x10] sm:$0xff]  ;;  %v1346_v2 = vsub.s32 0, %v1990_v20 }
 0x530   : > { %v1656_v17 = vpack.c.bf16 %v1136_v16, %v1135_v11 }
 0x531   : > { %v1105_v5 = vsel %vm538_vm1, %v1102_v3, 0.0 }
 0x532   : > { %1106 = vadd.xlane.f32.xlu1 %v1105_v5  ;;  %1657 = vmatpush3.bf16.msra.mxu0 %v1656_v17 }
 0x533   : > { %1635 = vmatprep.subr.mxu0 %v1798_v7 }
 0x5bf   : > { %v1107_v6 = vpop.xlane.xlu1 %1106 }
 0x5c0   : > { %v1109_v8 = vmul.f32 0.03125, %v1107_v6 }
 0x5c2   : > { %v1110_v9 = vsub.f32 %v1102_v3, %v1109_v8 }
 0x5c4   : > { %v1111_v10 = vmul.f32 %v1110_v9, %v1110_v9 }
 0x5c6   : > { %v1112_v12 = vsel %vm538_vm1, %v1111_v10, 0.0 }
 0x5c7   : > { %1113 = vadd.xlane.f32.xlu0 %v1112_v12 }
 0x654   : > { %v1114_v28 = vpop.xlane.xlu0 %1113 }
 0x655   : > { %v1115_v29 = vmul.f32 0.03125, %v1114_v28 }
 0x657   : > { %v1116_v30 = vadd.f32 1e-05, %v1115_v29 }
 0x659   : > { %1728 = vrsqrt.f32 %v1116_v30 }
 0x663   : > { %v1729_v31 = vpop.eup %1728 }
 0x664   : > { %v1118_v33 = vmul.f32 %v1729_v31, %v1110_v9 }
 0x666   : > { %v1125_v35 = vmul.f32 %v1512_v32, %v1118_v33 }
 0x668   : > { %v1132_v36 = vadd.f32 %v1513_v34, %v1125_v35 }
 0x66a   : > { %1614 = vmatmul.mubr.msk.f32.vlgmr.msra.gmra.mrb[6].mxu0 %vm538_vm1, %v1132_v36 }
 0x66b   : > { %1637 = vmatprep.mubr.msk.f32.mxu0 %vm1797_vm0, %v1798_v7  ;;  %v1516_v7 = vld [vmem:[%s2161_s13] ss:$0 sm:$0xff] }
 0x73d   : > { %v1213_v40 = vpop.f32.mrb[6].mxu0 }
 0x73e   : > { %v1214_v41 = vadd.f32 %v1514_v39, %v1213_v40  ;;  %v1615_v42 = vpop.f32.mrb[7].mxu0 }
 0x740   : > { %v1217_v43 = vmax.f32 %v1214_v41, 0.0 }
 0x742   : > { %1633 = vmatmul.mubr.msk.f32.vlgmr.msra.gmra.mrb[8].mxu1 %vm1233_vm5, %v1217_v43 }
 0x815   : > { %v1303_v44 = vpop.f32.mrb[8].mxu1 }
 0x816   : > { %v1304_v45 = vadd.f32 %v1516_v7, %v1303_v44  ;;  %v1634_v46 = vpop.f32.mrb[9].mxu1 }
 0x818   : > { %v1307_v47 = vadd.f32 %v1304_v45, %v1132_v36 }
 0x81a   : > { %v1310_v48 = vsel %vm538_vm1, %v1307_v47, 0.0 }
 0x81b   : > { %1311 = vadd.xlane.f32.xlu0 %v1310_v48 }
 0x831   : > { %1341 = vperm.xlu0 %1719, %v1338_v54  }
 0x8a8   : > { %v1312_v49 = vpop.xlane.xlu0 %1311 }
 0x8a9   : > { %v1313_v50 = vmul.f32 0.03125, %v1312_v49 }
 0x8ab   : > { %v1314_v51 = vsub.f32 %v1307_v47, %v1313_v50 }
 0x8ad   : > { %v1315_v52 = vmul.f32 %v1314_v51, %v1314_v51 }
 0x8af   : > { %v1316_v53 = vsel %vm538_vm1, %v1315_v52, 0.0 }
 0x8b0   : > { %1317 = vadd.xlane.f32.xlu1 %v1316_v53  ;;  %v1342_v3 = vpop.permute.xlu0 %1341 }
 0x8b1   : > { %v1347_v5 = vrot.slane %v1342_v3, %v1346_v2 }
 0x93d   : > { %v1318_v56 = vpop.xlane.xlu1 %1317 }
 0x93e   : > { %v1319_v57 = vmul.f32 0.03125, %v1318_v56 }
 0x940   : > { %v1320_v58 = vadd.f32 1e-05, %v1319_v57 }
 0x942   : > { %1730 = vrsqrt.f32 %v1320_v58 }
 0x94c   : > { %v1731_v59 = vpop.eup %1730 }
 0x94d   : > { %v1322_v61 = vmul.f32 %v1731_v59, %v1314_v51 }
 0x94f   : > { %v1329_v63 = vmul.f32 %v1518_v60, %v1322_v61 }
 0x951   : > { %v1336_v0 = vadd.f32 %v1519_v62, %v1329_v63 }
 0x953   : > { %1636 = vmatpush3.xpose.msk.msra.mxu0 %vm538_vm1, %v1336_v0 }
 0x956   : > { %1638 = vmatmul.mubr.msk.f32.vlgmr.msra.gmra.mrb[8].mxu0 %vm538_vm1, %v1337_v1 }
 0xa29   : > { %v1420_v6 = vpop.f32.mrb[8].mxu0 }
 0xa2a   : > { %v1421_v8 = vadd.f32 %v1420_v6, %v1347_v5  ;;  %v1639_v9 = vpop.f32.mrb[9].mxu0 }
 0xa2c   : > { %1425 = vst.msk [vmem:[%s513_s1] sm:$0x1] %vm1424_vm6, %v1421_v8 }
 0xa2d   : > { %1745 = shalt.err (!%p1742_p3)
}
 0xa2e   : > { %s1746_s22 = scalar_lea.hbm %s2106_s21, 16  ;;  %s1750_s30 = scalar_lea.hbm %s2164_s16, 32 }
 0xa2f   : > { %p1747_p4 = scmp.ne.s32.totalorder %s2106_s21, %s1746_s22  ;;  %p1751_p9 = scmp.lt.u32.totalorder %s2106_s21, %s2164_s16 }
 0xa30   : > { %p1752_p10 = scmp.lt.u32.totalorder %s1750_s30, %s1746_s22  ;;  %p1754_p12 = scmp.lt.u32.totalorder %s1746_s22, %s2106_s21 }
 0xa31   : > { %p1748_p7 = pnand %p1747_p4, %p1933_p5 }
 0xa32   : > { %p1753_p11 = por %p1752_p10, %p1751_p9 }
 0xa33   : > { %p1749_p8 = pneg %p1748_p7 }
 0xa34   : > { %p1755_p13 = por %p1754_p12, %p1753_p11 }
 0xa36   : > { %p1756_p0 = pnand %p1755_p13, %p1749_p8 }
 0xa38   : > { %1759 = shalt.err (!%p1756_p0)
}
 0xa39   : > { %1670 = dma.vmem_to_hbm [thread:$0]  (%p1933_p5), %s2108_s29, 16, %s2106_s21, %s1427_s20  }
 0xa3a PF: > { %p1676_p1 = scmp.ge.s32.totalorder %s1794_s26, 2  ;;  %s1451_s3 = sand.u32 1, %s1782_s23  }
 0xa3b   : > { %s1452_s0 = scalar_lea.sflag [#allocation4], %s1451_s3 }
 0xa3c   : > { %p1673_p2 = pnand %p1676_p1, %p1937_p6 }
 0xa3e   : > { %1777 = dma.done.wait (!%p1673_p2), %s1452_s0, 16  }
 0xa3f   : > { %1779 = vsyncadd (!%p1673_p2), %s1452_s0, 4294967280  ;;  %s2176_s15 = sld [smem:[#allocation6_spill]]  ;;  %p28_p3 = scmp.ge.s32.totalorder %s1920_s28, 4  }
 0xa40   : > { %s2177_s23 = smov %s1786_s24  ;;  %s2178_s24 = smov %s1790_s25 }
 0xa41   : > { %s2180_s26 = smov %s1920_s28  ;;  %30 = sbr.rel (!%p28_p3) target bundleno = 8 (0x8), region = 120 }
 0xa45   : > { %s2179_s25 = smov %s2176_s15 }
 0xa48   :  { %1456 = vsyncpa [#allocation4], 1 }
 0xa49   :  { %1458 = vsyncpa [#allocation4 + $0x1], 1 }

</bundles_post_ra>
